<compile_context>
chip_gen: v5e
topology: v5e:2x2
jax: 0.10.0
libtpu: 0.0.40
codegen_flags: <defaults>
</compile_context>

<pallas_src>
import functools

import jax
import jax.numpy as jnp
from jax.experimental import pallas as pl
from jax.experimental.pallas import tpu as pltpu


def _elu(x):
    # exp only on the non-positive branch operand (keeps the positive branch overflow-free).
    return jnp.where(x > 0, x, jnp.exp(jnp.minimum(x, 0.0)) - 1.0)


@functools.lru_cache(maxsize=None)
def _vmem_limit_bytes():
    """Generation-aware scoped-VMEM budget.

    v7x has only 64 MiB physical VMEM per TensorCore, v5e/v6e have 128 MiB; request physical
    minus ~16 MiB headroom (compiler-internal scratch + pipeline double buffers), capped at
    112 MiB.
    """
    phys = 64 * 1024 * 1024  # conservative fallback (v7x-sized)
    try:
        phys = int(pltpu.get_tpu_info().vmem_capacity_bytes)
    except Exception:
        pass
    return max(32 * 1024 * 1024, min(phys - 16 * 1024 * 1024, 112 * 1024 * 1024))


def _gat_compiler_params():
    return pltpu.CompilerParams(
        dimension_semantics=("parallel",),
        vmem_limit_bytes=_vmem_limit_bytes(),
    )


def _pick_row_tile(n, requested=None):
    """Row tile must divide N and be a multiple of 32 (int8 adj sublane tiling), or equal N.

    Cap raised to 512 (mem-bound kernels reach ~85% of HBM roofline at tile 512 on v6e) and we
    keep >= 2 grid steps when N allows so the "parallel" axis can feed both v7x TensorCores.
    """
    if requested is not None:
        assert requested == n or (n % requested == 0 and requested % 32 == 0), (
            f"row_tile={requested} incompatible with N={n}")
        return requested
    if n % 32 != 0:
        # TODO(synk): pad N to a multiple of 32 (with isolated, un-pooled nodes) instead of
        # falling back to a single grid step.
        return n
    cap = min(n, 512)
    if n >= 64:
        cap = min(cap, n // 2)          # at least 2 grid steps (v7x megacore)
        cap = max(cap - cap % 32, 32)
    t = cap
    while n % t != 0:
        t -= 32
    return max(t, 32)


# --------------------- per-layer constant preparation (glue) -------------------
def _augment_weight(w, heads, out_ch):
    """[F_in, H*C] -> [F_in, H*(C+1)]: append a zero column per head (for the ones lane)."""
    f_in = w.shape[0]
    w_r = w.reshape(f_in, heads, out_ch)
    pad = jnp.zeros((f_in, heads, 1), w.dtype)
    return jnp.concatenate([w_r, pad], axis=-1).reshape(f_in, heads * (out_ch + 1))


def _ones_pattern(heads, out_ch):
    """[1, H*(C+1)] row that is 1.0 exactly at each head's appended ones lane."""
    hca = heads * (out_ch + 1)
    row = jnp.zeros((1, hca), jnp.float32)
    return row.at[0, out_ch::out_ch + 1].set(1.0)


def _build_att_matrix(att_src, att_dst):
    """Block-diagonal [H*(C+1), 2H] so xp_aug @ A = [alpha_src | alpha_dst] for all heads.

    The row corresponding to each head's ones lane is zero, so the augmentation does not
    perturb the attention logits.
    """
    heads, out_ch = att_src.shape
    pad = jnp.zeros((heads, 1), att_src.dtype)
    a_s = jnp.concatenate([att_src, pad], axis=1)                                # [H, C+1]
    a_d = jnp.concatenate([att_dst, pad], axis=1)                                # [H, C+1]
    eye = jnp.eye(heads, dtype=att_src.dtype)                                    # [H, H]
    a_s = (a_s[:, :, None] * eye[:, None, :]).reshape(heads * (out_ch + 1), heads)
    a_d = (a_d[:, :, None] * eye[:, None, :]).reshape(heads * (out_ch + 1), heads)
    return jnp.concatenate([a_s, a_d], axis=1)                                   # [H*(C+1), 2H]


# --------------------------- GAT layer: kernel 1 ------------------------------
def _project_kernel(x_ref, w_ref, a_ref, ones_ref, xp_ref, alpha_ref):
    # xp_aug = x @ W_aug + ones_pattern  (bf16 operands, f32 accumulation on the MXU);
    # per-head layout is [x W_h | 1] so kernel 2 can fold the softmax denominator into its
    # aggregation matmul.
    x = x_ref[...].astype(jnp.bfloat16)
    xp = jnp.dot(x, w_ref[...], preferred_element_type=jnp.float32) + ones_ref[...]
    # all heads' alpha_src / alpha_dst in one small matmul (keeps the XLU idle)
    alpha_ref[...] = jnp.dot(xp.astype(jnp.bfloat16), a_ref[...],
                             preferred_element_type=jnp.float32)                 # [T, 2H] f32
    xp_ref[...] = xp.astype(jnp.bfloat16)


# --------------------------- GAT layer: kernel 2 ------------------------------
def _attn_kernel(adj_ref, adst_ref, asrcT_ref, xp_ref, bias_ref, out_ref,
                 *, heads, out_ch, concat, apply_elu):
    edge = adj_ref[...] != 0                                                     # [T, N] (int8 mask)
    a_dst = adst_ref[...]                                                        # [T, H] f32
    a_srcT = asrcT_ref[...]                                                      # [H, N] f32
    xp = xp_ref[...]                                                             # [N, H*(C+1)] bf16
    bias = bias_ref[...]                                                         # [1, out_dim] f32
    neg = jnp.float32(-1e30)
    caug = out_ch + 1

    parts = []
    for h in range(heads):                                                       # heads small & static
        # scores[i, j] = alpha_dst[i] + alpha_src[j]   (message j -> i), f32 score pipeline
        s = a_dst[:, h:h + 1] + a_srcT[h:h + 1, :]                               # [T, N]
        s = jnp.where(s > 0, s, 0.2 * s)                                         # leaky_relu(0.2)
        s = jnp.where(edge, s, neg)                                              # mask non-edges
        m = jnp.max(s, axis=-1, keepdims=True)                                   # row max (stability)
        e = jnp.exp(s - m)                                                       # masked -> 0
        # Aggregation AND softmax denominator in one bf16 MXU matmul:
        #   e @ [xh | 1] -> [T, C+1]; last lane is sum_j e_ij  (no XLU sum, no [T,N] normalize)
        xh_aug = xp[:, h * caug:(h + 1) * caug]                                  # [N, C+1] bf16
        agg = jnp.dot(e.astype(jnp.bfloat16), xh_aug,
                      preferred_element_type=jnp.float32)                        # [T, C+1] f32
        inv = pl.reciprocal(agg[:, out_ch:out_ch + 1], approx=True)              # EUP slot
        parts.append(agg[:, :out_ch] * inv)                                      # [T, C]

    if concat:
        # single lane-dense store of the full [T, H*C] tile (no per-head masked partial stores)
        o = jnp.concatenate(parts, axis=-1) + bias
    else:
        acc = parts[0]
        for p in parts[1:]:
            acc = acc + p
        o = acc * (1.0 / heads) + bias
    if apply_elu:
        o = _elu(o)
    out_ref[...] = o.astype(out_ref.dtype)                                       # bf16 writeback


def gat_layer(x, w, att_src, att_dst, bias, adj_i8, *,
              heads, out_ch, concat, apply_elu, row_tile=None):
    n, f_in = x.shape
    caug = out_ch + 1
    hca = heads * caug
    out_dim = heads * out_ch if concat else out_ch
    tile = _pick_row_tile(n, row_tile)
    grid = (n // tile,)
    cparams = _gat_compiler_params()

    w_aug = _augment_weight(w, heads, out_ch).astype(jnp.bfloat16)
    a_aug = _build_att_matrix(att_src, att_dst).astype(jnp.bfloat16)
    ones_row = _ones_pattern(heads, out_ch)

    # ---- kernel 1: projection + attention logits (row-tiled, parallel grid) ----
    xp, alpha = pl.pallas_call(
        _project_kernel,
        grid=grid,
        out_shape=(jax.ShapeDtypeStruct((n, hca), jnp.bfloat16),
                   jax.ShapeDtypeStruct((n, 2 * heads), jnp.float32)),
        in_specs=[pl.BlockSpec((tile, f_in), lambda i: (i, 0)),
                  pl.BlockSpec((f_in, hca), lambda i: (0, 0)),
                  pl.BlockSpec((hca, 2 * heads), lambda i: (0, 0)),
                  pl.BlockSpec((1, hca), lambda i: (0, 0))],
        out_specs=(pl.BlockSpec((tile, hca), lambda i: (i, 0)),
                   pl.BlockSpec((tile, 2 * heads), lambda i: (i, 0))),
        compiler_params=cparams,
    )(x, w_aug, a_aug, ones_row)

    a_dst = alpha[:, heads:]                     # [N, H]
    a_src_t = jnp.transpose(alpha[:, :heads])    # [H, N]  (one tiny transpose, done once in XLA)

    # ---- kernel 2: masked softmax + aggregation (row-tiled, parallel grid) ----
    kern = functools.partial(_attn_kernel, heads=heads, out_ch=out_ch,
                             concat=concat, apply_elu=apply_elu)
    out = pl.pallas_call(
        kern,
        grid=grid,
        out_shape=jax.ShapeDtypeStruct((n, out_dim), jnp.bfloat16),    # bf16 inter-layer features
        in_specs=[pl.BlockSpec((tile, n), lambda i: (i, 0)),           # adj row-tile (int8 mask)
                  pl.BlockSpec((tile, heads), lambda i: (i, 0)),       # alpha_dst rows
                  pl.BlockSpec((heads, n), lambda i: (0, 0)),          # alpha_src (all sources)
                  pl.BlockSpec((n, hca), lambda i: (0, 0)),            # xp_aug for all sources
                  pl.BlockSpec((1, out_dim), lambda i: (0, 0))],       # bias
        out_specs=pl.BlockSpec((tile, out_dim), lambda i: (i, 0)),
        compiler_params=cparams,
    )(adj_i8, a_dst, a_src_t, xp, bias.reshape(1, -1))
    return out


# --------------------- pooling + MLP head (single kernel) ---------------------
def _head_kernel(h_ref, pool_ref, w1_ref, b1_ref, s1_ref, t1_ref,
                 w2_ref, b2_ref, s2_ref, t2_ref, wo_ref, bo_ref, out_ref):
    bf = jnp.bfloat16
    # global_mean_pool as a matmul with the normalized membership matrix [G, N]
    pooled = jnp.dot(pool_ref[...].astype(bf), h_ref[...].astype(bf),
                     preferred_element_type=jnp.float32)
    z = jnp.dot(pooled.astype(bf), w1_ref[...].astype(bf),
                preferred_element_type=jnp.float32) + b1_ref[...]
    z = jnp.maximum(z, 0.0)
    z = z * s1_ref[...] + t1_ref[...]          # BatchNorm1d (eval), folded scale/shift
    z = jnp.dot(z.astype(bf), w2_ref[...].astype(bf),
                preferred_element_type=jnp.float32) + b2_ref[...]
    z = jnp.maximum(z, 0.0)
    z = z * s2_ref[...] + t2_ref[...]
    out_ref[...] = jnp.dot(z.astype(bf), wo_ref[...].astype(bf),
                           preferred_element_type=jnp.float32) + bo_ref[...]


def mlp_head(h, pool, w1, b1, s1, t1, w2, b2, s2, t2, wo, bo):
    g = pool.shape[0]
    vmem = pl.BlockSpec(memory_space=pltpu.MemorySpace.VMEM)
    args = (h, pool,
            w1, b1.reshape(1, -1), s1.reshape(1, -1), t1.reshape(1, -1),
            w2, b2.reshape(1, -1), s2.reshape(1, -1), t2.reshape(1, -1),
            wo, bo.reshape(1, -1))
    return pl.pallas_call(
        _head_kernel,
        out_shape=jax.ShapeDtypeStruct((g, 1), jnp.float32),
        in_specs=[vmem] * len(args),
        out_specs=vmem,
    )(*args)


# --------------------------------- forward -----------------------------------
def gat_simple_forward(params, x, adj, pool, *, row_tile=None):
    # adj is only ever used as a mask -> int8 quarters the dominant per-layer HBM stream
    adj_i8 = (adj != 0).astype(jnp.int8)
    # gatin: GATConv(in_channel, hidden, heads=H) + dropout(id) + elu
    p = params["gatin"]
    h = gat_layer(x, p["w"], p["att_src"], p["att_dst"], p["bias"], adj_i8,
                  heads=p["heads"], out_ch=p["out_ch"], concat=True, apply_elu=True,
                  row_tile=row_tile)
    # hidden GAT layers + dropout(id) + elu
    for p in params["gat_layers"]:
        h = gat_layer(h, p["w"], p["att_src"], p["att_dst"], p["bias"], adj_i8,
                      heads=p["heads"], out_ch=p["out_ch"], concat=True, apply_elu=True,
                      row_tile=row_tile)
    # gatout: heads=1, concat=False, then elu
    p = params["gatout"]
    h = gat_layer(h, p["w"], p["att_src"], p["att_dst"], p["bias"], adj_i8,
                  heads=p["heads"], out_ch=p["out_ch"], concat=False, apply_elu=True,
                  row_tile=row_tile)
    # global_mean_pool + fc1/relu/bn1 + fc2/relu/bn2 + output
    hp = params["head"]
    return mlp_head(h, pool, hp["w1"], hp["b1"], hp["s1"], hp["t1"],
                    hp["w2"], hp["b2"], hp["s2"], hp["t2"], hp["wo"], hp["bo"])


# ------------------------------ param creation --------------------------------
def _init_gat(key, f_in, out_ch, heads, concat):
    k = jax.random.split(key, 4)
    bias_dim = heads * out_ch if concat else out_ch
    return {
        "w": 0.1 * jax.random.normal(k[0], (f_in, heads * out_ch), jnp.float32),
        "att_src": 0.1 * jax.random.normal(k[1], (heads, out_ch), jnp.float32),
        "att_dst": 0.1 * jax.random.normal(k[2], (heads, out_ch), jnp.float32),
        "bias": 0.1 * jax.random.normal(k[3], (bias_dim,), jnp.float32),
        "heads": heads, "out_ch": out_ch,
    }


def _init_bn(key, dim, eps=1e-5):
    k = jax.random.split(key, 4)
    gamma = 1.0 + 0.1 * jax.random.normal(k[0], (dim,), jnp.float32)
    beta = 0.1 * jax.random.normal(k[1], (dim,), jnp.float32)
    rmean = 0.1 * jax.random.normal(k[2], (dim,), jnp.float32)
    rvar = 0.5 + jnp.abs(jax.random.normal(k[3], (dim,), jnp.float32))
    scale = gamma / jnp.sqrt(rvar + eps)
    shift = beta - rmean * scale
    return scale, shift


def make_params(key, gnn_layers, in_channel, hidden_channel, linear_hidden, heads=8):
    keys = jax.random.split(key, 6 + gnn_layers)
    params = {"gatin": _init_gat(keys[0], in_channel, hidden_channel, heads, True)}
    params["gat_layers"] = [
        _init_gat(keys[1 + i], hidden_channel * heads, hidden_channel, heads, True)
        for i in range(gnn_layers)
    ]
    params["gatout"] = _init_gat(keys[1 + gnn_layers], hidden_channel * heads,
                                 hidden_channel, 1, False)
    kh = jax.random.split(keys[2 + gnn_layers], 8)
    s1, t1 = _init_bn(kh[6], linear_hidden)
    s2, t2 = _init_bn(kh[7], linear_hidden)
    params["head"] = {
        "w1": 0.1 * jax.random.normal(kh[0], (hidden_channel, linear_hidden), jnp.float32),
        "b1": 0.1 * jax.random.normal(kh[1], (linear_hidden,), jnp.float32),
        "w2": 0.1 * jax.random.normal(kh[2], (linear_hidden, linear_hidden), jnp.float32),
        "b2": 0.1 * jax.random.normal(kh[3], (linear_hidden,), jnp.float32),
        "wo": 0.1 * jax.random.normal(kh[4], (linear_hidden, 1), jnp.float32),
        "bo": 0.1 * jax.random.normal(kh[5], (1,), jnp.float32),
        "s1": s1, "t1": t1, "s2": s2, "t2": t2,
    }
    return params


if __name__ == "__main__":
    key = jax.random.PRNGKey(0)
    k_x, k_p = jax.random.split(key)

    # small config: 2 graphs of 32 nodes each (N=64 -> two 32-row tiles exercise the grid,
    # so the "parallel" axis has work for both TensorCores on a megacore chip)
    NODES_PER_GRAPH, G = 32, 2
    N = NODES_PER_GRAPH * G
    gnn_layers, in_channel, hidden_channel, linear_hidden, heads = 1, 4, 8, 32, 8
    # NOTE: with hidden_channel=8 the per-head aggregation matmul uses only 8 output lanes;
    # real configs should prefer out_ch (or H*out_ch) >= 128 for MXU/store lane occupancy.

    x = jax.random.normal(k_x, (N, in_channel), jnp.float32)
    batch = jnp.repeat(jnp.arange(G, dtype=jnp.int32), NODES_PER_GRAPH)

    # deterministic bidirectional ring within each graph
    src, dst = [], []
    for g in range(G):
        base = g * NODES_PER_GRAPH
        for i in range(NODES_PER_GRAPH):
            j = (i + 1) % NODES_PER_GRAPH
            src += [base + i, base + j]
            dst += [base + j, base + i]
    edge_index = jnp.array([src, dst], dtype=jnp.int32)

    # dense adjacency (glue): adj[i, j] = 1 iff edge j -> i; add self loops (GATConv default)
    adj = jnp.zeros((N, N), jnp.float32).at[edge_index[1], edge_index[0]].set(1.0)
    adj = adj.at[jnp.arange(N), jnp.arange(N)].set(1.0)

    # normalized pooling matrix for global_mean_pool (glue)
    pool = (batch[None, :] == jnp.arange(G)[:, None]).astype(jnp.float32)
    pool = pool / jnp.sum(pool, axis=-1, keepdims=True)

    params = make_params(k_p, gnn_layers, in_channel, hidden_channel, linear_hidden, heads)

    out = gat_simple_forward(params, x, adj, pool)
    out = jax.block_until_ready(out)
    assert out.shape == (G, 1)
    assert bool(jnp.all(jnp.isfinite(out)))
    print("KERNEL_OK")
</pallas_src>

<mosaic_0001>
module attributes {stable_mosaic.version = 11 : i64} {
  func.func @_project_kernel(%arg0: i32, %arg1: memref<32x4xf32, #tpu.memory_space<vmem>>, %arg2: memref<4x72xbf16, #tpu.memory_space<vmem>>, %arg3: memref<72x16xbf16, #tpu.memory_space<vmem>>, %arg4: memref<1x72xf32, #tpu.memory_space<vmem>>, %arg5: memref<32x72xbf16, #tpu.memory_space<vmem>>, %arg6: memref<32x16xf32, #tpu.memory_space<vmem>>) attributes {dimension_semantics = [#tpu.dimension_semantics<parallel>], iteration_bounds = array<i64: 2>, scalar_prefetch = 0 : i64, scratch_operands = 0 : i64, tpu.core_type = #tpu.core_type<tc>, window_params = [{transform_indices = @transform_0, window_bounds = array<i64: 32, 4>}, {pipeline_mode = #tpu.pipeline_mode<synchronous>, transform_indices = @transform_1, window_bounds = array<i64: 4, 72>}, {pipeline_mode = #tpu.pipeline_mode<synchronous>, transform_indices = @transform_2, window_bounds = array<i64: 72, 16>}, {pipeline_mode = #tpu.pipeline_mode<synchronous>, transform_indices = @transform_3, window_bounds = array<i64: 1, 72>}, {transform_indices = @transform_4, window_bounds = array<i64: 32, 72>}, {transform_indices = @transform_5, window_bounds = array<i64: 32, 16>}]} {
    %c0 = arith.constant 0 : index
    %c0_0 = arith.constant 0 : index
    %0 = vector.load %arg1[%c0, %c0_0] : memref<32x4xf32, #tpu.memory_space<vmem>>, vector<32x4xf32>
    %1 = arith.truncf %0 : vector<32x4xf32> to vector<32x4xbf16>
    %c0_1 = arith.constant 0 : index
    %c0_2 = arith.constant 0 : index
    %2 = vector.load %arg2[%c0_1, %c0_2] : memref<4x72xbf16, #tpu.memory_space<vmem>>, vector<4x72xbf16>
    %cst = arith.constant dense<0.000000e+00> : vector<32x72xf32>
    %3 = tpu.matmul %1, %2, %cst {dimension_numbers = #tpu.dot_dimension_numbers<[1], [0], [0], [1], [0, 0, 1, 1], [], []>} : vector<32x4xbf16>, vector<4x72xbf16>, vector<32x72xf32> -> vector<32x72xf32>
    %c0_3 = arith.constant 0 : index
    %c0_4 = arith.constant 0 : index
    %4 = vector.load %arg4[%c0_3, %c0_4] : memref<1x72xf32, #tpu.memory_space<vmem>>, vector<1x72xf32>
    %5 = vector.broadcast %4 : vector<1x72xf32> to vector<32x72xf32>
    %6 = arith.addf %3, %5 : vector<32x72xf32>
    %7 = arith.truncf %6 : vector<32x72xf32> to vector<32x72xbf16>
    %c0_5 = arith.constant 0 : index
    %c0_6 = arith.constant 0 : index
    %8 = vector.load %arg3[%c0_5, %c0_6] : memref<72x16xbf16, #tpu.memory_space<vmem>>, vector<72x16xbf16>
    %cst_7 = arith.constant dense<0.000000e+00> : vector<32x16xf32>
    %9 = tpu.matmul %7, %8, %cst_7 {dimension_numbers = #tpu.dot_dimension_numbers<[1], [0], [0], [1], [0, 0, 1, 1], [], []>} : vector<32x72xbf16>, vector<72x16xbf16>, vector<32x16xf32> -> vector<32x16xf32>
    %c0_8 = arith.constant 0 : index
    %c0_9 = arith.constant 0 : index
    %10 = vector.load %arg6[%c0_8, %c0_9] : memref<32x16xf32, #tpu.memory_space<vmem>>, vector<32x16xf32>
    tpu.vector_store %arg6[%c0_8, %c0_9], %9 {strides = array<i32>} : memref<32x16xf32, #tpu.memory_space<vmem>>, vector<32x16xf32>,
    %11 = arith.truncf %6 : vector<32x72xf32> to vector<32x72xbf16>
    %c0_10 = arith.constant 0 : index
    %c0_11 = arith.constant 0 : index
    %12 = vector.load %arg5[%c0_10, %c0_11] : memref<32x72xbf16, #tpu.memory_space<vmem>>, vector<32x72xbf16>
    tpu.vector_store %arg5[%c0_10, %c0_11], %11 {strides = array<i32>} : memref<32x72xbf16, #tpu.memory_space<vmem>>, vector<32x72xbf16>,
    return
  }
  func.func @transform_0(%arg0: i32) -> (i32, i32) {
    %c0_i32 = arith.constant 0 : i32
    %c0_i32_0 = arith.constant 0 : i32
    return %arg0, %c0_i32 : i32, i32
  }
  func.func @transform_1(%arg0: i32) -> (i32, i32) {
    %c0_i32 = arith.constant 0 : i32
    %c0_i32_0 = arith.constant 0 : i32
    %c0_i32_1 = arith.constant 0 : i32
    return %c0_i32, %c0_i32_0 : i32, i32
  }
  func.func @transform_2(%arg0: i32) -> (i32, i32) {
    %c0_i32 = arith.constant 0 : i32
    %c0_i32_0 = arith.constant 0 : i32
    %c0_i32_1 = arith.constant 0 : i32
    return %c0_i32, %c0_i32_0 : i32, i32
  }
  func.func @transform_3(%arg0: i32) -> (i32, i32) {
    %c0_i32 = arith.constant 0 : i32
    %c0_i32_0 = arith.constant 0 : i32
    %c0_i32_1 = arith.constant 0 : i32
    return %c0_i32, %c0_i32_0 : i32, i32
  }
  func.func @transform_4(%arg0: i32) -> (i32, i32) {
    %c0_i32 = arith.constant 0 : i32
    %c0_i32_0 = arith.constant 0 : i32
    return %arg0, %c0_i32 : i32, i32
  }
  func.func @transform_5(%arg0: i32) -> (i32, i32) {
    %c0_i32 = arith.constant 0 : i32
    %c0_i32_0 = arith.constant 0 : i32
    return %arg0, %c0_i32 : i32, i32
  }
}

</mosaic_0001>

<bundles_post_ra>
// kernel: tpu_custom_call.1
= control target key start
LH: loop header
LB: loop body
LE: loop exit
PB: predicated region body
PF: predicated region fallthrough
CT: control target
= control target key end

     0   :  { %11 = vsyncpa [#allocation3], 0  ;;  %s790_s0 = inlined_call_operand.vmem [shape: f32[64,4], index: 0, kind: input, shape index: {}]   ;;  %s791_s1 = inlined_call_operand.vmem [shape: bf16[4,72], index: 1, kind: input, shape index: {}]   ;;  %s792_s2 = inlined_call_operand.vmem [shape: bf16[72,16], index: 2, kind: input, shape index: {}]   ;;  %s793_s3 = inlined_call_operand.vmem [shape: f32[1,72], index: 3, kind: input, shape index: {}]   ;;  %s794_s4 = inlined_call_operand.hbm [shape: bf16[64,72], index: 4, kind: output, shape index: {0}]   ;;  %s795_s5 = inlined_call_operand.vmem [shape: f32[64,16], index: 5, kind: output, shape index: {1}]  }
   0x1   :  { %13 = vsyncpa [#allocation3 + $0x1], 0  ;;  %s667_s18 = smov 0   ;;  %s669_s19 = smov 0  }
   0x2   :  { %s671_s20 = smov 0   ;;  %s673_s21 = smov 0  }
   0x3 LB: > { %s688_s22 = sadd.s32 4294967295, %s633_s21   ;;  %s484_s23 = sadd.s32 4294967294, %s633_s21   ;;  %s633_s21 = sphi %s673_s21, %s801_s21   ;;  %s629_s20 = sphi %s671_s20, %s800_s20   ;;  %s625_s19 = sphi %s669_s19, %s799_s19   ;;  %s621_s18 = sphi %s667_s18, %s798_s18  }
   0x4   : > { %s692_s24 = sadd.s32 1, %s633_s21   ;;  %s115_s25 = sadd.s32 1, %s629_s20 }
   0x5   : > { %s112_s26 = ssub.s32 %s633_s21, %s692_s24  ;;  %p125_p0 = scmp.ne.s32.totalorder %s629_s20, %s625_s19 }
   0x6   : > { %p113_p1 = scmp.eq.s32.totalorder %s112_s26, 0  ;;  %p126_p2 = scmp.eq.s32.totalorder %s688_s22, 1 }
   0x7   : > { %p131_p3 = scmp.ne.s32.totalorder %s625_s19, %s621_s18  ;;  %p132_p4 = scmp.eq.s32.totalorder %s484_s23, 1 }
   0x8   : > { %s703_s27 = scalar_select %p113_p1, %s629_s20, %s115_s25  }
   0x9   : > { %p705_p5 = por %p126_p2, %p125_p0  ;;  %p709_p6 = por %p132_p4, %p131_p3 }
   0xa   : > { %p487_p7 = scmp.ge.s32.totalorder %s633_s21, 1  ;;  %p194_p8 = scmp.lt.s32.totalorder %s633_s21, 3 }
   0xc   : > { %p195_p9 = pnand %p487_p7, %p194_p8 }
   0xd   : > { %s489_s7 = sshll.u32 (!%p195_p9), %s688_s22, 2  ;;  %s217_s6 = sand.u32 (!%p195_p9), 1, %s625_s19  }
   0xe   : > { %198 = sbr.rel (%p195_p9) target bundleno = 316 (0x13c), region = 36  ;;  %p228_p10 = scmp.lt.s32.totalorder (!%p195_p9), %s489_s7, 7 }
   0xf   : > { %s488_s11 = sshll.u32 (!%p195_p9), %s217_s6, 4  ;;  %s522_s14 = sshll.u32 (!%p195_p9), %s688_s22, 4 }
  0x10   : > { %s219_s12 = scalar_lea.vmem (!%p195_p9), [#allocation2], %s488_s11  ;;  %s389_s17 = scalar_lea.hbm (!%p195_p9), %s794_s4, %s522_s14 }
  0x11   : > { %s392_s23 = sshll.u32 (!%p195_p9), %s389_s17, 4  ;;  %s373_s25 = scalar_lea.sflag (!%p195_p9), [#allocation3], %s217_s6  ;;  %s393_s23 = int_to_ptr.hbm [resolvable:$true] %s392_s23 }
  0x12   : > { %s585_s26 = sshra.s32 (!%p195_p9), %s393_s23, 4  ;;  %s591_s22 = scalar_lea.hbm (!%p195_p9), %s794_s4, 32  ;;  %s586_s26 = int_to_ptr.hbm [resolvable:$true] %s585_s26 }
  0x13   : > { %v247_v0 = vld [vmem:[%s791_s1] sm:$0x3]  ;;  %vm259_vm0 = vcmask 1041408   ;;  %s803_s7 = smov (!%p228_p10, %s489_s7), 7  ;;  %vm339_vm1 = vcmask 1043456   ;;  %vm252_vm2 = vcmask 31744   ;;  %p592_p0 = scmp.lt.s32.totalorder %s586_s26, %s794_s4 }
  0x14   : > { %v261_v1 = vsel %vm259_vm0, %v247_v0, 0  ;;  %v294_v2 = vld [vmem:[%s792_s2 + $0x20] sm:$0xf]  ;;  %s490_s10 = sshll.u32 %s803_s7, 3  ;;  %v521_v12 = vld [vmem:[%s792_s2 + $0x18] sm:$0xff]  ;;  %v520_v13 = vld [vmem:[%s792_s2 + $0x10] sm:$0xff] }
  0x15   : > { %270 = vmatpush.bf16.msra.mxu0 %v261_v1  ;;  %523 = vmatpush.bf16.msra.mxu3 %v261_v1  ;;  %v322_v3 = vunpack.c.l.b16 %v294_v2  ;;  %s231_s13 = scalar_lea.vmem %s790_s0, %s490_s10  ;;  %v519_v14 = vld [vmem:[%s792_s2 + $0x8] sm:$0xff]  ;;  %v518_v15 = vld [vmem:[%s792_s2] sm:$0xff]  ;;  %vm367_vm3 = vcmask 584704   ;;  %vm332_vm4 = vcmask 588800   ;;  %s587_s30 = scalar_lea.hbm %s586_s26, 16 }
  0x16   : > { %v241_v6 = vld [vmem:[%s231_s13] sm:$0xff]  ;;  %v242_v7 = vld [vmem:[%s231_s13 + $0x8] sm:$0xff]  ;;  %v243_v8 = vld [vmem:[%s231_s13 + $0x10] sm:$0xff]  ;;  %p588_p11 = scmp.ne.s32.totalorder %s586_s26, %s587_s30  ;;  %p593_p1 = scmp.lt.s32.totalorder %s591_s22, %s587_s30 }
  0x17   : > { %v327_v4 = vpack.c.b16 %v322_v3, %v322_v3  ;;  %v245_v9 = vpack.c.bf16 %v242_v7, %v241_v6  ;;  %v244_v10 = vld [vmem:[%s231_s13 + $0x18] sm:$0xff]  ;;  %v570_v16 = vld [vmem:[%s793_s3] ss:$0 sm:$0xff]  ;;  %s390_s13 = sshll.u32 %s219_s12, 4  ;;  %s391_s13 = int_to_ptr.vmem [resolvable:$true] %s390_s13 }
  0x18   : > { %v246_v11 = vpack.c.bf16 %v244_v10, %v243_v8  ;;  %p589_p12 = pnand %p588_p11, %p705_p5  ;;  %p594_p2 = por %p593_p1, %p592_p0 }
  0x19   : > { %v341_v5 = vsel %vm339_vm1, %v327_v4, 0  ;;  %493 = vmatmul.msk.bf16.vlgmr.msra.gmra.mxu0 %vm252_vm2, %v245_v9 }
  0x1a   : > { %346 = vmatpush.bf16.msra.mxu1 %v341_v5  ;;  %524 = vmatpush.bf16.msra.mxu2 %v341_v5  ;;  %p590_p13 = pneg %p589_p12 }
  0x1b   : > { %494 = vmatmul.msk.bf16.vlgmr.msra.gmra.mxu3 %vm252_vm2, %v246_v11 }
  0x1c   : > { %p595_p3 = pnand %p594_p2, %p590_p13 }
  0x1e   : > { %347 = vmatpush.bf16.msra.mxu1 %v521_v12  ;;  %525 = vmatpush.bf16.msra.mxu2 %v521_v12 }
  0x22   : > { %348 = vmatpush.bf16.msra.mxu1 %v520_v13  ;;  %526 = vmatpush.bf16.msra.mxu2 %v520_v13 }
  0x26   : > { %349 = vmatpush.bf16.msra.mxu1 %v519_v14  ;;  %527 = vmatpush.bf16.msra.mxu2 %v519_v14 }
  0x2a   : > { %350 = vmatpush.bf16.msra.mxu1 %v518_v15  ;;  %528 = vmatpush.bf16.msra.mxu2 %v518_v15 }
  0x96   : > { %v272_v17 = vpop.f32.mrf.mxu0 }
  0x97   : > { %v273_v18 = vadd.f32 %v570_v16, %v272_v17 }
  0x99   : > { %v282_v19 = vpack.c.bf16 %v273_v18, %v273_v18 }
  0x9b   : > { %368 = vst.msk [vmem:[%s219_s12] sm:$0xf] %vm367_vm3, %v282_v19  ;;  %v299_v25 = vunpack.c.l.b16 %v282_v19 }
  0x9e   : > { %v277_v20 = vpop.f32.mrf.mxu3  ;;  %v274_v22 = vpop.f32.mrf.mxu0 }
  0x9f   : > { %v278_v21 = vadd.f32 %v570_v16, %v277_v20  ;;  %v275_v23 = vadd.f32 %v570_v16, %v274_v22 }
  0xa1   : > { %v284_v24 = vpack.c.bf16 %v278_v21, %v278_v21  ;;  %v283_v26 = vpack.c.bf16 %v275_v23, %v275_v23 }
  0xa3   : > { %370 = vst.msk [vmem:[%s219_s12 + $0x8] sm:$0xf] %vm367_vm3, %v284_v24  ;;  %v300_v27 = vunpack.c.l.b16 %v283_v26  ;;  %v301_v32 = vunpack.c.l.b16 %v284_v24 }
  0xa4   : > { %369 = vst.msk [vmem:[%s219_s12 + $0x4] sm:$0xf] %vm367_vm3, %v283_v26 }
  0xa5   : > { %v303_v29 = vpack.c.b16 %v300_v27, %v299_v25 }
  0xa6   : > { %v279_v28 = vpop.f32.mrf.mxu3 }
  0xa7   : > { %v280_v30 = vadd.f32 %v570_v16, %v279_v28  ;;  %511 = vmatmul.msk.bf16.vlgmr.msra.gmra.mxu1 %vm332_vm4, %v303_v29 }
  0xa9   : > { %v285_v31 = vpack.c.bf16 %v280_v30, %v280_v30 }
  0xab   : > { %v302_v33 = vunpack.c.l.b16 %v285_v31  ;;  %371 = vst.msk [vmem:[%s219_s12 + $0xc] sm:$0xf] %vm367_vm3, %v285_v31 }
  0xad   : > { %v304_v34 = vpack.c.b16 %v302_v33, %v301_v32 }
  0xaf   : > { %512 = vmatmul.msk.bf16.vlgmr.msra.gmra.mxu2 %vm332_vm4, %v304_v34 }
  0xb0   : > { %598 = shalt.err (!%p595_p3)
}
  0xb1   : > { %s635_s6 = smov 64   ;;  %s636_s14 = smov 4   ;;  %vm362_vm5 = vcmask 130048  }
  0xb2   : > { %529 = dma.vmem_to_hbm [thread:$0]  (%p705_p5), %s391_s13, 256, %s393_s23, %s373_s25, %s635_s6, %s635_s6, %s636_s14  }
  0xb3   : > { %s238_s17 = scalar_lea.vmem %s795_s5, %s490_s10 }
 0x124   : > { %v352_v35 = vpop.f32.mrf.mxu1 }
 0x125   : > { %363 = vst.msk [vmem:[%s238_s17] sm:$0xff] %vm362_vm5, %v352_v35 }
 0x12c   : > { %v354_v36 = vpop.f32.mrf.mxu1 }
 0x12d   : > { %364 = vst.msk [vmem:[%s238_s17 + $0x8] sm:$0xff] %vm362_vm5, %v354_v36 }
 0x132   : > { %v357_v37 = vpop.f32.mrf.mxu2 }
 0x133   : > { %365 = vst.msk [vmem:[%s238_s17 + $0x10] sm:$0xff] %vm362_vm5, %v357_v37 }
 0x13a   : > { %v359_v38 = vpop.f32.mrf.mxu2 }
 0x13b   : > { %366 = vst.msk [vmem:[%s238_s17 + $0x18] sm:$0xff] %vm362_vm5, %v359_v38 }
 0x13c PF: > { %p535_p4 = scmp.ge.s32.totalorder %s633_s21, 2  ;;  %s411_s28 = sand.u32 1, %s621_s18  }
 0x13d   : > { %s412_s7 = scalar_lea.sflag [#allocation3], %s411_s28 }
 0x13e   : > { %p532_p5 = pnand %p535_p4, %p709_p6 }
 0x140   : > { %p533_p7 = pneg %p532_p5 }
 0x142   : > { %616 = dma.done.wait (%p533_p7), %s412_s7, 256  }
 0x143   : > { %618 = vsyncadd (%p533_p7), %s412_s7, 4294967040  ;;  %p16_p8 = scmp.ge.s32.totalorder %s692_s24, 4   ;;  %s798_s18 = smov %s625_s19 }
 0x144   : > { %s799_s19 = smov %s629_s20  ;;  %s800_s20 = smov %s703_s27 }
 0x145   : > { %s801_s21 = smov %s692_s24  ;;  %18 = sbr.rel (!%p16_p8) target bundleno = 3 (0x3), region = 83 }
 0x14a   :  { %426 = vsyncpa [#allocation3], 1 }
 0x14b   :  { %428 = vsyncpa [#allocation3 + $0x1], 1 }

</bundles_post_ra>
